<compile_context>
chip_gen: v6e
topology: v6e:2x2x1
jax: 0.10.0
libtpu: 0.0.40
codegen_flags: <defaults>
</compile_context>

<pallas_src>
import math
import functools

import jax
import jax.numpy as jnp
from jax.experimental import pallas as pl
from jax.experimental.pallas import tpu as pltpu

_INV_SQRT2 = 1.0 / math.sqrt(2.0)


def _ff_kernel(x_ref, gamma_ref, beta_ref, w1_ref, b1_ref, w2_ref, b2_ref,
               o_ref, *scratch, true_dim, pad_dim, acc_in_out):
    if acc_in_out:
        (xn_ref,) = scratch
        acc_ref = o_ref                      # output block is resident across j
    else:
        xn_ref, acc_ref = scratch

    j = pl.program_id(1)

    # ---- LayerNorm(dim), eps=1e-5, elementwise affine: once per row tile ----
    @pl.when(j == 0)
    def _():
        x = x_ref[...].astype(jnp.float32)                     # (TM, Dp)
        inv_d = 1.0 / float(true_dim)
        mean = jnp.sum(x, axis=-1, keepdims=True) * inv_d
        diff = x - mean
        # Padded feature lanes hold zeros, so each contributes mean**2 to the
        # sum of squares; subtract that analytically -> exact true variance.
        ssq = jnp.sum(diff * diff, axis=-1, keepdims=True) \
            - float(pad_dim - true_dim) * (mean * mean)
        var = ssq * inv_d
        xn = diff * jax.lax.rsqrt(var + 1e-5) * gamma_ref[...] + beta_ref[...]
        xn_ref[...] = xn.astype(xn_ref.dtype)
        acc_ref[...] = jnp.zeros_like(acc_ref)

    # ---- Linear(dim -> hidden chunk) + exact erf GELU (nn.GELU() default) ----
    h = jnp.dot(xn_ref[...], w1_ref[0],
                preferred_element_type=jnp.float32) + b1_ref[...]
    h = 0.5 * h * (1.0 + jax.lax.erf(h * _INV_SQRT2))
    # Dropout(p=0.0) is the identity.

    # ---- Linear(hidden chunk -> dim), accumulated in f32 over hidden chunks --
    acc_ref[...] += jnp.dot(h.astype(w2_ref.dtype), w2_ref[...],
                            preferred_element_type=jnp.float32)

    @pl.when(j == pl.num_programs(1) - 1)
    def _():
        o_ref[...] = (acc_ref[...] + b2_ref[...]).astype(o_ref.dtype)


def _round_up(x, m):
    return pl.cdiv(x, m) * m


def _vmem_budget_and_row_target():
    """Generation-specific VMEM budget (bytes) and default row tile."""
    kind = ""
    try:
        kind = jax.devices()[0].device_kind.lower()
    except Exception:
        pass
    cap = None
    try:
        cap = int(pltpu.get_tpu_info().vmem_capacity_bytes)
    except Exception:
        cap = None
    if cap is None:
        if ("v5" in kind) or ("v6" in kind):
            cap = 128 << 20
        else:
            cap = 64 << 20                      # conservative: v7x per-TC VMEM
    if ("v7" in kind) or ("7x" in kind):
        cap = min(cap, 64 << 20)                # v7x: 64 MiB per TensorCore
    row_target = 256 if "v5" in kind else 512   # v5e saturates at smaller tiles
    # Leave headroom for Mosaic internal scratch instead of requesting it all.
    return int(cap * 0.85), row_target


def feed_forward_pallas(x, gamma, beta, w1, b1, w2, b2, *,
                        param_dtype=jnp.bfloat16,
                        row_tile=None, hidden_tile=None):
    """FeedForward forward pass.

    x: (..., dim); w1: (dim, hidden); w2: (hidden, dim).
    param_dtype: matmul/storage dtype for w1/w2/xn/h (accumulation stays f32).
    row_tile / hidden_tile: optional overrides; defaults are generation-aware
    and auto-shrunk to fit the per-core VMEM budget.
    """
    orig_shape = x.shape
    dim = orig_shape[-1]
    hidden = w1.shape[1]
    rows = math.prod(orig_shape[:-1])

    mm_dtype = jnp.dtype(param_dtype) if param_dtype is not None \
        else jnp.dtype(jnp.float32)
    out_dtype = x.dtype
    acc_in_out = jnp.dtype(out_dtype) == jnp.dtype(jnp.float32)

    budget, row_target = _vmem_budget_and_row_target()
    if row_tile is None:
        row_tile = row_target
    if hidden_tile is None:
        hidden_tile = 1024 if budget > (80 << 20) else 512

    # Lane-dense padding of feature dims (unmasked stores need 128 multiples).
    dp = _round_up(dim, 128)
    hp = _round_up(hidden, 128)          # pad hidden to 128 only (no over-pad)
    m_units = hp // 128

    def pick_hidden_tile(target):
        d_target = max(1, min(target // 128, m_units))
        for d in range(d_target, 0, -1):
            if m_units % d == 0:
                return 128 * d
        return 128

    ht = pick_hidden_tile(hidden_tile)

    # Row tile: multiple of 16 (covers bf16 sublane packing); clamp for tiny
    # inputs so they are not padded to a full target-size tile.
    row_tile = max(16, _round_up(min(row_tile, _round_up(rows, 16)), 16))

    mm_bytes = mm_dtype.itemsize
    x_bytes = jnp.dtype(x.dtype).itemsize
    out_bytes = jnp.dtype(out_dtype).itemsize

    def est_vmem(rt, ht_):
        b = 2 * rt * dp * x_bytes            # x block (double-buffered)
        b += 2 * rt * dp * out_bytes         # output block
        b += 2 * 3 * dp * 4                  # gamma, beta, b2
        b += 4 * dp * ht_ * mm_bytes         # w1 + w2 chunks, double-buffered
        b += 2 * ht_ * 4                     # b1 chunk
        b += rt * dp * mm_bytes              # xn scratch
        if not acc_in_out:
            b += rt * dp * 4                 # f32 accumulator scratch
        return b

    # Shrink tiles until the working set fits the per-core VMEM budget.
    while est_vmem(row_tile, ht) > budget and ht > 128:
        ht = pick_hidden_tile(ht // 2)
    while est_vmem(row_tile, ht) > budget and row_tile > 128:
        row_tile = max(128, _round_up(row_tile // 2, 16))

    # Avoid activation padding + final slice when a divisor-of-rows tile exists.
    if rows >= 16 and rows % row_tile:
        lo = max(16, (row_tile // 2 // 16) * 16)
        for cand in range(row_tile - 16, lo - 1, -16):
            if rows % cand == 0:
                row_tile = cand
                break
    pr = _round_up(rows, row_tile)

    def pad_to(a, tgt_shape):
        pads = tuple((0, t - s) for s, t in zip(a.shape, tgt_shape))
        return jnp.pad(a, pads) if any(p[1] for p in pads) else a

    x2 = pad_to(x.reshape(rows, dim), (pr, dp))
    gamma2 = pad_to(gamma.reshape(1, dim).astype(jnp.float32), (1, dp))
    beta2 = pad_to(beta.reshape(1, dim).astype(jnp.float32), (1, dp))
    b1_2 = pad_to(b1.reshape(1, hidden).astype(jnp.float32), (1, hp))
    b2_2 = pad_to(b2.reshape(1, dim).astype(jnp.float32), (1, dp))
    w1_p = pad_to(w1.astype(mm_dtype), (dp, hp))
    w2_p = pad_to(w2.astype(mm_dtype), (hp, dp))

    n_chunks = hp // ht
    # Chunk-major layout for w1 so each streamed (dp, ht) chunk is a fully
    # contiguous HBM run (one-time wrapper cost, not per row tile).
    w1_cm = jnp.transpose(w1_p.reshape(dp, n_chunks, ht), (1, 0, 2))

    kernel = functools.partial(_ff_kernel, true_dim=dim, pad_dim=dp,
                               acc_in_out=acc_in_out)

    scratch_shapes = [pltpu.VMEM((row_tile, dp), mm_dtype)]      # normalized x
    if not acc_in_out:
        scratch_shapes.append(pltpu.VMEM((row_tile, dp), jnp.float32))

    grid = (pr // row_tile, n_chunks)
    call = pl.pallas_call(
        kernel,
        out_shape=jax.ShapeDtypeStruct((pr, dp), out_dtype),
        grid_spec=pltpu.PrefetchScalarGridSpec(
            num_scalar_prefetch=0,
            grid=grid,
            in_specs=[
                pl.BlockSpec((row_tile, dp), lambda i, j: (i, 0)),    # x rows
                pl.BlockSpec((1, dp), lambda i, j: (0, 0)),           # gamma
                pl.BlockSpec((1, dp), lambda i, j: (0, 0)),           # beta
                pl.BlockSpec((1, dp, ht), lambda i, j: (j, 0, 0)),    # w1 chunk
                pl.BlockSpec((1, ht), lambda i, j: (0, j)),           # b1 chunk
                pl.BlockSpec((ht, dp), lambda i, j: (j, 0)),          # w2 chunk
                pl.BlockSpec((1, dp), lambda i, j: (0, 0)),           # b2
            ],
            out_specs=pl.BlockSpec((row_tile, dp), lambda i, j: (i, 0)),
            scratch_shapes=scratch_shapes,
        ),
        compiler_params=pltpu.CompilerParams(
            dimension_semantics=("parallel", "arbitrary"),
            vmem_limit_bytes=budget,
        ),
    )
    out = call(x2, gamma2, beta2, w1_cm, b1_2, w2_p, b2_2)
    if pr != rows or dp != dim:
        out = out[:rows, :dim]
    return out.reshape(orig_shape)


if __name__ == "__main__":
    # Small shapes consistent with the module: tokens of feature size `dim`.
    batch, seq, dim, hidden = 2, 8, 32, 64

    key = jax.random.PRNGKey(0)
    kx, kw1, kb1, kw2, kb2 = jax.random.split(key, 5)

    x = jax.random.normal(kx, (batch, seq, dim), dtype=jnp.float32)

    # Deterministic parameter init (mimicking nn.Linear default uniform ranges).
    gamma = jnp.ones((dim,), jnp.float32)              # LayerNorm weight
    beta = jnp.zeros((dim,), jnp.float32)              # LayerNorm bias
    bound1 = 1.0 / math.sqrt(dim)
    w1 = jax.random.uniform(kw1, (dim, hidden), jnp.float32, -bound1, bound1)
    b1 = jax.random.uniform(kb1, (hidden,), jnp.float32, -bound1, bound1)
    bound2 = 1.0 / math.sqrt(hidden)
    w2 = jax.random.uniform(kw2, (hidden, dim), jnp.float32, -bound2, bound2)
    b2 = jax.random.uniform(kb2, (dim,), jnp.float32, -bound2, bound2)

    # Pure-JAX reference (same math path, no Pallas).
    def ref(xv):
        mean = jnp.mean(xv, -1, keepdims=True)
        var = jnp.mean((xv - mean) ** 2, -1, keepdims=True)
        xn = (xv - mean) * jax.lax.rsqrt(var + 1e-5) * gamma + beta
        h = xn @ w1 + b1
        h = 0.5 * h * (1.0 + jax.lax.erf(h / math.sqrt(2.0)))
        return h @ w2 + b2

    expected = ref(x)

    # Exact-dtype path (f32 weights): tight tolerance.
    out_f32 = feed_forward_pallas(x, gamma, beta, w1, b1, w2, b2,
                                  param_dtype=jnp.float32)
    jax.block_until_ready(out_f32)
    assert out_f32.shape == x.shape
    err_f32 = float(jnp.max(jnp.abs(out_f32 - expected)))
    assert jnp.allclose(out_f32, expected, atol=2e-5, rtol=2e-5), err_f32

    # Default fast path: bf16 matmul operands, f32 accumulation.
    out_bf16 = feed_forward_pallas(x, gamma, beta, w1, b1, w2, b2)
    jax.block_until_ready(out_bf16)
    assert out_bf16.shape == x.shape
    assert jnp.allclose(out_bf16, expected, atol=5e-2, rtol=5e-2)

    # bf16 activations exercise the separate-f32-accumulator code path.
    out_act = feed_forward_pallas(x.astype(jnp.bfloat16), gamma, beta,
                                  w1, b1, w2, b2)
    jax.block_until_ready(out_act)
    assert jnp.allclose(out_act.astype(jnp.float32), expected,
                        atol=1e-1, rtol=1e-1)

    print("KERNEL_OK")
</pallas_src>

<mosaic_0001>
module attributes {stable_mosaic.version = 11 : i64} {
  func.func @_ff_kernel(%arg0: i32, %arg1: i32, %arg2: memref<16x128xf32, #tpu.memory_space<vmem>>, %arg3: memref<1x128xf32, #tpu.memory_space<vmem>>, %arg4: memref<1x128xf32, #tpu.memory_space<vmem>>, %arg5: memref<1x128x128xf32, #tpu.memory_space<vmem>>, %arg6: memref<1x128xf32, #tpu.memory_space<vmem>>, %arg7: memref<128x128xf32, #tpu.memory_space<vmem>>, %arg8: memref<1x128xf32, #tpu.memory_space<vmem>>, %arg9: memref<16x128xf32, #tpu.memory_space<vmem>>, %arg10: memref<16x128xf32, #tpu.memory_space<vmem>>) attributes {dimension_semantics = [#tpu.dimension_semantics<parallel>, #tpu.dimension_semantics<arbitrary>], iteration_bounds = array<i64: 1, 1>, scalar_prefetch = 0 : i64, scratch_operands = 1 : i64, tpu.core_type = #tpu.core_type<tc>, window_params = [{transform_indices = @transform_0, window_bounds = array<i64: 16, 128>}, {pipeline_mode = #tpu.pipeline_mode<synchronous>, transform_indices = @transform_1, window_bounds = array<i64: 1, 128>}, {pipeline_mode = #tpu.pipeline_mode<synchronous>, transform_indices = @transform_2, window_bounds = array<i64: 1, 128>}, {transform_indices = @transform_3, window_bounds = array<i64: 1, 128, 128>}, {transform_indices = @transform_4, window_bounds = array<i64: 1, 128>}, {transform_indices = @transform_5, window_bounds = array<i64: 128, 128>}, {pipeline_mode = #tpu.pipeline_mode<synchronous>, transform_indices = @transform_6, window_bounds = array<i64: 1, 128>}, {transform_indices = @transform_7, window_bounds = array<i64: 16, 128>}]} {
    %c0_i32 = arith.constant 0 : i32
    %0 = arith.cmpi eq, %arg1, %c0_i32 : i32
    %1 = arith.extui %0 : i1 to i32
    %c0_i32_0 = arith.constant 0 : i32
    %2 = arith.cmpi ne, %1, %c0_i32_0 : i32
    scf.if %2 {
      %c0_19 = arith.constant 0 : index
      %c0_20 = arith.constant 0 : index
      %26 = vector.load %arg2[%c0_19, %c0_20] : memref<16x128xf32, #tpu.memory_space<vmem>>, vector<16x128xf32>
      %cst_21 = arith.constant dense<0.000000e+00> : vector<16xf32>
      %27 = vector.multi_reduction <add>, %26, %cst_21 [1] : vector<16x128xf32> to vector<16xf32>
      %28 = vector.shape_cast %27 : vector<16xf32> to vector<16x1xf32>
      %cst_22 = arith.constant 3.125000e-02 : f32
      %29 = vector.broadcast %cst_22 : f32 to vector<16x1xf32>
      %30 = arith.mulf %28, %29 : vector<16x1xf32>
      %31 = vector.broadcast %30 : vector<16x1xf32> to vector<16x128xf32>
      %32 = arith.subf %26, %31 : vector<16x128xf32>
      %33 = arith.mulf %32, %32 : vector<16x128xf32>
      %cst_23 = arith.constant dense<0.000000e+00> : vector<16xf32>
      %34 = vector.multi_reduction <add>, %33, %cst_23 [1] : vector<16x128xf32> to vector<16xf32>
      %35 = vector.shape_cast %34 : vector<16xf32> to vector<16x1xf32>
      %36 = arith.mulf %30, %30 : vector<16x1xf32>
      %cst_24 = arith.constant 9.600000e+01 : f32
      %37 = vector.broadcast %cst_24 : f32 to vector<16x1xf32>
      %38 = arith.mulf %37, %36 : vector<16x1xf32>
      %39 = arith.subf %35, %38 : vector<16x1xf32>
      %cst_25 = arith.constant 3.125000e-02 : f32
      %40 = vector.broadcast %cst_25 : f32 to vector<16x1xf32>
      %41 = arith.mulf %39, %40 : vector<16x1xf32>
      %cst_26 = arith.constant 9.99999974E-6 : f32
      %42 = vector.broadcast %cst_26 : f32 to vector<16x1xf32>
      %43 = arith.addf %41, %42 : vector<16x1xf32>
      %44 = math.rsqrt %43 : vector<16x1xf32>
      %45 = vector.broadcast %44 : vector<16x1xf32> to vector<16x128xf32>
      %46 = arith.mulf %32, %45 : vector<16x128xf32>
      %c0_27 = arith.constant 0 : index
      %c0_28 = arith.constant 0 : index
      %47 = vector.load %arg3[%c0_27, %c0_28] : memref<1x128xf32, #tpu.memory_space<vmem>>, vector<1x128xf32>
      %48 = vector.broadcast %47 : vector<1x128xf32> to vector<16x128xf32>
      %49 = arith.mulf %46, %48 : vector<16x128xf32>
      %c0_29 = arith.constant 0 : index
      %c0_30 = arith.constant 0 : index
      %50 = vector.load %arg4[%c0_29, %c0_30] : memref<1x128xf32, #tpu.memory_space<vmem>>, vector<1x128xf32>
      %51 = vector.broadcast %50 : vector<1x128xf32> to vector<16x128xf32>
      %52 = arith.addf %49, %51 : vector<16x128xf32>
      %c0_31 = arith.constant 0 : index
      %c0_32 = arith.constant 0 : index
      %53 = vector.load %arg10[%c0_31, %c0_32] : memref<16x128xf32, #tpu.memory_space<vmem>>, vector<16x128xf32>
      tpu.vector_store %arg10[%c0_31, %c0_32], %52 {strides = array<i32>} : memref<16x128xf32, #tpu.memory_space<vmem>>, vector<16x128xf32>,
      %cst_33 = arith.constant 0.000000e+00 : f32
      %54 = vector.broadcast %cst_33 : f32 to vector<16x128xf32>
      %c0_34 = arith.constant 0 : index
      %c0_35 = arith.constant 0 : index
      %55 = vector.load %arg9[%c0_34, %c0_35] : memref<16x128xf32, #tpu.memory_space<vmem>>, vector<16x128xf32>
      tpu.vector_store %arg9[%c0_34, %c0_35], %54 {strides = array<i32>} : memref<16x128xf32, #tpu.memory_space<vmem>>, vector<16x128xf32>,
    } else {
    }
    %c0 = arith.constant 0 : index
    %c0_1 = arith.constant 0 : index
    %3 = vector.load %arg10[%c0, %c0_1] : memref<16x128xf32, #tpu.memory_space<vmem>>, vector<16x128xf32>
    %c0_2 = arith.constant 0 : index
    %c0_3 = arith.constant 0 : index
    %c0_4 = arith.constant 0 : index
    %4 = vector.load %arg5[%c0_2, %c0_3, %c0_4] : memref<1x128x128xf32, #tpu.memory_space<vmem>>, vector<1x128x128xf32>
    %5 = vector.shape_cast %4 : vector<1x128x128xf32> to vector<128x128xf32>
    %cst = arith.constant dense<0.000000e+00> : vector<16x128xf32>
    %6 = tpu.matmul %3, %5, %cst {dimension_numbers = #tpu.dot_dimension_numbers<[1], [0], [0], [1], [0, 0, 1, 1], [], []>} : vector<16x128xf32>, vector<128x128xf32>, vector<16x128xf32> -> vector<16x128xf32>
    %c0_5 = arith.constant 0 : index
    %c0_6 = arith.constant 0 : index
    %7 = vector.load %arg6[%c0_5, %c0_6] : memref<1x128xf32, #tpu.memory_space<vmem>>, vector<1x128xf32>
    %8 = vector.broadcast %7 : vector<1x128xf32> to vector<16x128xf32>
    %9 = arith.addf %6, %8 : vector<16x128xf32>
    %cst_7 = arith.constant 5.000000e-01 : f32
    %10 = vector.broadcast %cst_7 : f32 to vector<16x128xf32>
    %11 = arith.mulf %10, %9 : vector<16x128xf32>
    %cst_8 = arith.constant 0.707106769 : f32
    %12 = vector.broadcast %cst_8 : f32 to vector<16x128xf32>
    %13 = arith.mulf %9, %12 : vector<16x128xf32>
    %14 = math.erf %13 : vector<16x128xf32>
    %cst_9 = arith.constant 1.000000e+00 : f32
    %15 = vector.broadcast %cst_9 : f32 to vector<16x128xf32>
    %16 = arith.addf %15, %14 : vector<16x128xf32>
    %17 = arith.mulf %11, %16 : vector<16x128xf32>
    %c0_10 = arith.constant 0 : index
    %c0_11 = arith.constant 0 : index
    %18 = vector.load %arg9[%c0_10, %c0_11] : memref<16x128xf32, #tpu.memory_space<vmem>>, vector<16x128xf32>
    %c0_12 = arith.constant 0 : index
    %c0_13 = arith.constant 0 : index
    %19 = vector.load %arg7[%c0_12, %c0_13] : memref<128x128xf32, #tpu.memory_space<vmem>>, vector<128x128xf32>
    %cst_14 = arith.constant dense<0.000000e+00> : vector<16x128xf32>
    %20 = tpu.matmul %17, %19, %cst_14 {dimension_numbers = #tpu.dot_dimension_numbers<[1], [0], [0], [1], [0, 0, 1, 1], [], []>} : vector<16x128xf32>, vector<128x128xf32>, vector<16x128xf32> -> vector<16x128xf32>
    %21 = arith.addf %18, %20 : vector<16x128xf32>
    %c0_15 = arith.constant 0 : index
    %c0_16 = arith.constant 0 : index
    %22 = vector.load %arg9[%c0_15, %c0_16] : memref<16x128xf32, #tpu.memory_space<vmem>>, vector<16x128xf32>
    tpu.vector_store %arg9[%c0_15, %c0_16], %21 {strides = array<i32>} : memref<16x128xf32, #tpu.memory_space<vmem>>, vector<16x128xf32>,
    %c0_i32_17 = arith.constant 0 : i32
    %23 = arith.cmpi eq, %arg1, %c0_i32_17 : i32
    %24 = arith.extui %23 : i1 to i32
    %c0_i32_18 = arith.constant 0 : i32
    %25 = arith.cmpi ne, %24, %c0_i32_18 : i32
    scf.if %25 {
      %c0_19 = arith.constant 0 : index
      %c0_20 = arith.constant 0 : index
      %26 = vector.load %arg9[%c0_19, %c0_20] : memref<16x128xf32, #tpu.memory_space<vmem>>, vector<16x128xf32>
      %c0_21 = arith.constant 0 : index
      %c0_22 = arith.constant 0 : index
      %27 = vector.load %arg8[%c0_21, %c0_22] : memref<1x128xf32, #tpu.memory_space<vmem>>, vector<1x128xf32>
      %28 = vector.broadcast %27 : vector<1x128xf32> to vector<16x128xf32>
      %29 = arith.addf %26, %28 : vector<16x128xf32>
      %c0_23 = arith.constant 0 : index
      %c0_24 = arith.constant 0 : index
      %30 = vector.load %arg9[%c0_23, %c0_24] : memref<16x128xf32, #tpu.memory_space<vmem>>, vector<16x128xf32>
      tpu.vector_store %arg9[%c0_23, %c0_24], %29 {strides = array<i32>} : memref<16x128xf32, #tpu.memory_space<vmem>>, vector<16x128xf32>,
    } else {
    }
    return
  }
  func.func @transform_0(%arg0: i32, %arg1: i32) -> (i32, i32) {
    %c0_i32 = arith.constant 0 : i32
    %c0_i32_0 = arith.constant 0 : i32
    return %arg0, %c0_i32 : i32, i32
  }
  func.func @transform_1(%arg0: i32, %arg1: i32) -> (i32, i32) {
    %c0_i32 = arith.constant 0 : i32
    %c0_i32_0 = arith.constant 0 : i32
    %c0_i32_1 = arith.constant 0 : i32
    return %c0_i32, %c0_i32_0 : i32, i32
  }
  func.func @transform_2(%arg0: i32, %arg1: i32) -> (i32, i32) {
    %c0_i32 = arith.constant 0 : i32
    %c0_i32_0 = arith.constant 0 : i32
    %c0_i32_1 = arith.constant 0 : i32
    return %c0_i32, %c0_i32_0 : i32, i32
  }
  func.func @transform_3(%arg0: i32, %arg1: i32) -> (i32, i32, i32) {
    %c0_i32 = arith.constant 0 : i32
    %c0_i32_0 = arith.constant 0 : i32
    %c0_i32_1 = arith.constant 0 : i32
    return %arg1, %c0_i32, %c0_i32_0 : i32, i32, i32
  }
  func.func @transform_4(%arg0: i32, %arg1: i32) -> (i32, i32) {
    %c0_i32 = arith.constant 0 : i32
    %c0_i32_0 = arith.constant 0 : i32
    return %c0_i32, %arg1 : i32, i32
  }
  func.func @transform_5(%arg0: i32, %arg1: i32) -> (i32, i32) {
    %c0_i32 = arith.constant 0 : i32
    %c0_i32_0 = arith.constant 0 : i32
    return %arg1, %c0_i32 : i32, i32
  }
  func.func @transform_6(%arg0: i32, %arg1: i32) -> (i32, i32) {
    %c0_i32 = arith.constant 0 : i32
    %c0_i32_0 = arith.constant 0 : i32
    %c0_i32_1 = arith.constant 0 : i32
    return %c0_i32, %c0_i32_0 : i32, i32
  }
  func.func @transform_7(%arg0: i32, %arg1: i32) -> (i32, i32) {
    %c0_i32 = arith.constant 0 : i32
    %c0_i32_0 = arith.constant 0 : i32
    return %arg0, %c0_i32 : i32, i32
  }
}

</mosaic_0001>

<bundles_post_ra>
// kernel: tpu_custom_call.1
= control target key start
LH: loop header
LB: loop body
LE: loop exit
PB: predicated region body
PF: predicated region fallthrough
CT: control target
= control target key end

     0   :  { %12 = vsyncpa [#allocation4], 0  ;;  %s668_s0 = inlined_call_operand.hbm [shape: f32[16,128], index: 0, kind: input, shape index: {}]   ;;  %s669_s1 = inlined_call_operand.vmem [shape: f32[1,128], index: 1, kind: input, shape index: {}]   ;;  %s670_s2 = inlined_call_operand.vmem [shape: f32[1,128], index: 2, kind: input, shape index: {}]   ;;  %s671_s3 = inlined_call_operand.hbm [shape: f32[1,128,128], index: 3, kind: input, shape index: {}]   ;;  %s672_s4 = inlined_call_operand.vmem [shape: f32[1,128], index: 4, kind: input, shape index: {}]   ;;  %s673_s5 = inlined_call_operand.hbm [shape: f32[128,128], index: 5, kind: input, shape index: {}]   ;;  %s674_s6 = inlined_call_operand.vmem [shape: f32[1,128], index: 6, kind: input, shape index: {}]   ;;  %s675_s7 = inlined_call_operand.hbm [shape: f32[16,128], index: 7, kind: output, shape index: {}]  }
   0x1   :  { %13 = vsyncpa [#allocation7], 0 }
   0x2   :  { %14 = vsyncpa [#allocation5], 0  ;;  %s576_s24 = smov [#allocation6]   ;;  %s577_s26 = smov [#allocation3]  }
   0x3   :  { %s36_s25 = sshll.u32 %s576_s24, 4  ;;  %s20_s27 = sshll.u32 %s577_s26, 4  ;;  %s37_s25 = int_to_ptr.vmem [resolvable:$true] %s36_s25  ;;  %s21_s27 = int_to_ptr.vmem [resolvable:$true] %s20_s27 }
   0x4   :  { %s498_s28 = scalar_lea.vmem %s37_s25, 2048  ;;  %p503_p1 = scmp.lt.s32.totalorder %s37_s25, %s37_s25 }
   0x5   :  { %p499_p0 = scmp.ne.s32.totalorder %s37_s25, %s498_s28  ;;  %p504_p2 = scmp.lt.s32.totalorder %s498_s28, %s498_s28 }
   0x7   :  { %p505_p3 = por %p504_p2, %p503_p1 }
   0x9   :  { %p506_p4 = pnand %p505_p3, %p499_p0 }
   0xb   :  { %509 = shalt.err (!%p506_p4)
}
   0xc   :  { %s578_s29 = smov 128   ;;  %s579_s30 = smov 8  }
   0xd   :  { %42 = dma.hbm_to_vmem [thread:$0]  %s671_s3, 2048, %s37_s25, [#allocation7], %s578_s29, %s578_s29, %s579_s30  }
   0xe   :  { %s518_s10 = scalar_lea.vmem %s21_s27, 256  ;;  %p523_p6 = scmp.lt.s32.totalorder %s21_s27, %s21_s27 }
   0xf   :  { %p519_p5 = scmp.ne.s32.totalorder %s21_s27, %s518_s10  ;;  %p524_p7 = scmp.lt.s32.totalorder %s518_s10, %s518_s10 }
  0x11   :  { %p525_p8 = por %p524_p7, %p523_p6 }
  0x13   :  { %p526_p9 = pnand %p525_p8, %p519_p5 }
  0x15   :  { %529 = shalt.err (!%p526_p9)
}
  0x16   :  { %26 = dma.hbm_to_vmem [thread:$0]  %s668_s0, 256, %s21_s27, [#allocation4], %s578_s29, %s578_s29, %s579_s30  }
  0x17   :  { %s580_s13 = smov [#allocation8]  }
  0x18   :  { %s50_s14 = sshll.u32 %s580_s13, 4  ;;  %s51_s14 = int_to_ptr.vmem [resolvable:$true] %s50_s14 }
  0x19   :  { %s538_s15 = scalar_lea.vmem %s51_s14, 2048  ;;  %p543_p11 = scmp.lt.s32.totalorder %s51_s14, %s51_s14 }
  0x1a   :  { %p539_p10 = scmp.ne.s32.totalorder %s51_s14, %s538_s15  ;;  %p544_p12 = scmp.lt.s32.totalorder %s538_s15, %s538_s15 }
  0x1c   :  { %p545_p13 = por %p544_p12, %p543_p11 }
  0x1e   :  { %p546_p0 = pnand %p545_p13, %p539_p10 }
  0x20   :  { %549 = shalt.err (!%p546_p0)
}
  0x21   :  { %56 = dma.hbm_to_vmem [thread:$0]  %s673_s5, 2048, %s51_s14, [#allocation7], %s578_s29, %s578_s29, %s579_s30  }
  0x22   :  { %570 = dma.done.wait [#allocation4], 256  }
  0x23   :  { %571 = vsyncadd [#allocation4], 4294967040 }
  0x24   :  { %572 = dma.done.wait [#allocation7], 4096  }
  0x25   :  { %573 = vsyncadd [#allocation7], 4294963200  ;;  %v72_v0 = vld [vmem:[#allocation3] sm:$0xff]  ;;  %v73_v1 = vld [vmem:[#allocation3 + $0x8] sm:$0xff]  ;;  %s581_s20 = smov [#allocation9]  }
  0x26   :  { %74 = vadd.xlane.f32.xlu0 %v72_v0  ;;  %v141_v2 = vld [vmem:[#allocation6 + $0x78] sm:$0xff]  ;;  %v140_v11 = vld [vmem:[#allocation6 + $0x70] sm:$0xff]  ;;  %v139_v12 = vld [vmem:[#allocation6 + $0x68] sm:$0xff]  ;;  %s352_s21 = sshll.u32 %s581_s20, 4  ;;  %s353_s21 = int_to_ptr.vmem [resolvable:$true] %s352_s21 }
  0x27   :  { %405 = vmatprep.subr.mxu0 %v141_v2  ;;  %v138_v13 = vld [vmem:[#allocation6 + $0x60] sm:$0xff]  ;;  %v137_v14 = vld [vmem:[#allocation6 + $0x58] sm:$0xff]  ;;  %v136_v15 = vld [vmem:[#allocation6 + $0x50] sm:$0xff]  ;;  %s550_s22 = scalar_lea.vmem %s353_s21, 256  ;;  %p555_p2 = scmp.lt.s32.totalorder %s353_s21, %s353_s21 }
  0x28   :  { %406 = vmatpush3.msra.mxu0 %v141_v2  ;;  %v135_v16 = vld [vmem:[#allocation6 + $0x48] sm:$0xff]  ;;  %v134_v17 = vld [vmem:[#allocation6 + $0x40] sm:$0xff]  ;;  %v133_v18 = vld [vmem:[#allocation6 + $0x38] sm:$0xff]  ;;  %p551_p1 = scmp.ne.s32.totalorder %s353_s21, %s550_s22  ;;  %p556_p3 = scmp.lt.s32.totalorder %s550_s22, %s550_s22 }
  0x29   :  { %407 = vmatprep.subr.mxu0 %v140_v11  ;;  %v132_v19 = vld [vmem:[#allocation6 + $0x30] sm:$0xff]  ;;  %v131_v20 = vld [vmem:[#allocation6 + $0x28] sm:$0xff]  ;;  %v130_v21 = vld [vmem:[#allocation6 + $0x20] sm:$0xff] }
  0x2a   :  { %76 = vadd.xlane.f32.xlu0 %v73_v1  ;;  %408 = vmatpush3.msra.mxu0 %v140_v11  ;;  %v129_v22 = vld [vmem:[#allocation6 + $0x18] sm:$0xff]  ;;  %v128_v23 = vld [vmem:[#allocation6 + $0x10] sm:$0xff]  ;;  %v127_v24 = vld [vmem:[#allocation6 + $0x8] sm:$0xff]  ;;  %p557_p4 = por %p556_p3, %p555_p2 }
  0x2b   :  { %409 = vmatprep.subr.mxu0 %v139_v12  ;;  %v126_v25 = vld [vmem:[#allocation6] sm:$0xff]  ;;  %v251_v26 = vld [vmem:[#allocation8 + $0x78] sm:$0xff]  ;;  %v250_v27 = vld [vmem:[#allocation8 + $0x70] sm:$0xff] }
  0x2c   :  { %410 = vmatpush3.msra.mxu0 %v139_v12  ;;  %440 = vmatprep.subr.mxu1 %v251_v26  ;;  %v249_v28 = vld [vmem:[#allocation8 + $0x68] sm:$0xff]  ;;  %v365_v42 = vld [vmem:[%s669_s1] ss:$0 sm:$0xff]  ;;  %v248_v51 = vld [vmem:[#allocation8 + $0x60] sm:$0xff]  ;;  %p558_p5 = pnand %p557_p4, %p551_p1 }
  0x2d   :  { %411 = vmatprep.subr.mxu0 %v138_v13  ;;  %441 = vmatpush3.msra.mxu1 %v251_v26  ;;  %v366_v44 = vld [vmem:[%s670_s2] ss:$0 sm:$0xff]  ;;  %v247_v52 = vld [vmem:[#allocation8 + $0x58] sm:$0xff]  ;;  %v245_v54 = vld [vmem:[#allocation8 + $0x48] sm:$0xff] }
  0x2e   :  { %412 = vmatpush3.msra.mxu0 %v138_v13  ;;  %442 = vmatprep.subr.mxu1 %v250_v27  ;;  %v246_v53 = vld [vmem:[#allocation8 + $0x50] sm:$0xff]  ;;  %v244_v55 = vld [vmem:[#allocation8 + $0x40] sm:$0xff]  ;;  %v243_v56 = vld [vmem:[#allocation8 + $0x38] sm:$0xff] }
  0x2f   :  { %413 = vmatprep.subr.mxu0 %v137_v14  ;;  %443 = vmatpush3.msra.mxu1 %v250_v27  ;;  %v242_v57 = vld [vmem:[#allocation8 + $0x30] sm:$0xff]  ;;  %v241_v58 = vld [vmem:[#allocation8 + $0x28] sm:$0xff]  ;;  %v240_v59 = vld [vmem:[#allocation8 + $0x20] sm:$0xff] }
  0x30   :  { %414 = vmatpush3.msra.mxu0 %v137_v14  ;;  %444 = vmatprep.subr.mxu1 %v249_v28  ;;  %v239_v60 = vld [vmem:[#allocation8 + $0x18] sm:$0xff]  ;;  %v238_v61 = vld [vmem:[#allocation8 + $0x10] sm:$0xff]  ;;  %v237_v62 = vld [vmem:[#allocation8 + $0x8] sm:$0xff] }
  0x31   :  { %415 = vmatprep.subr.mxu0 %v136_v15  ;;  %445 = vmatpush3.msra.mxu1 %v249_v28  ;;  %v236_v63 = vld [vmem:[#allocation8] sm:$0xff] }
  0x32   :  { %416 = vmatpush3.msra.mxu0 %v136_v15  ;;  %446 = vmatprep.subr.mxu1 %v248_v51 }
  0x33   :  { %417 = vmatprep.subr.mxu0 %v135_v16  ;;  %447 = vmatpush3.msra.mxu1 %v248_v51 }
  0x34   :  { %418 = vmatpush3.msra.mxu0 %v135_v16  ;;  %448 = vmatprep.subr.mxu1 %v247_v52  ;;  %v368_v16 = vld [vmem:[%s674_s6] ss:$0 sm:$0xff] }
  0x35   :  { %419 = vmatprep.subr.mxu0 %v134_v17  ;;  %449 = vmatpush3.msra.mxu1 %v247_v52 }
  0x36   :  { %420 = vmatpush3.msra.mxu0 %v134_v17  ;;  %450 = vmatprep.subr.mxu1 %v246_v53 }
  0x37   :  { %421 = vmatprep.subr.mxu0 %v133_v18  ;;  %451 = vmatpush3.msra.mxu1 %v246_v53 }
  0x38   :  { %422 = vmatpush3.msra.mxu0 %v133_v18  ;;  %452 = vmatprep.subr.mxu1 %v245_v54 }
  0x39   :  { %423 = vmatprep.subr.mxu0 %v132_v19  ;;  %453 = vmatpush3.msra.mxu1 %v245_v54 }
  0x3a   :  { %424 = vmatpush3.msra.mxu0 %v132_v19  ;;  %454 = vmatprep.subr.mxu1 %v244_v55 }
  0x3b   :  { %425 = vmatprep.subr.mxu0 %v131_v20  ;;  %455 = vmatpush3.msra.mxu1 %v244_v55 }
  0x3c   :  { %426 = vmatpush3.msra.mxu0 %v131_v20  ;;  %456 = vmatprep.subr.mxu1 %v243_v56 }
  0x3d   :  { %427 = vmatprep.subr.mxu0 %v130_v21  ;;  %457 = vmatpush3.msra.mxu1 %v243_v56 }
  0x3e   :  { %428 = vmatpush3.msra.mxu0 %v130_v21  ;;  %458 = vmatprep.subr.mxu1 %v242_v57 }
  0x3f   :  { %429 = vmatprep.subr.mxu0 %v129_v22  ;;  %459 = vmatpush3.msra.mxu1 %v242_v57 }
  0x40   :  { %430 = vmatpush3.msra.mxu0 %v129_v22  ;;  %460 = vmatprep.subr.mxu1 %v241_v58 }
  0x41   :  { %431 = vmatprep.subr.mxu0 %v128_v23  ;;  %461 = vmatpush3.msra.mxu1 %v241_v58 }
  0x42   :  { %432 = vmatpush3.msra.mxu0 %v128_v23  ;;  %462 = vmatprep.subr.mxu1 %v240_v59 }
  0x43   :  { %433 = vmatprep.subr.mxu0 %v127_v24  ;;  %463 = vmatpush3.msra.mxu1 %v240_v59 }
  0x44   :  { %434 = vmatpush3.msra.mxu0 %v127_v24  ;;  %464 = vmatprep.subr.mxu1 %v239_v60 }
  0x45   :  { %435 = vmatprep.subr.mxu0 %v126_v25  ;;  %465 = vmatpush3.msra.mxu1 %v239_v60 }
  0x46   :  { %436 = vmatpush3.msra.mxu0 %v126_v25  ;;  %466 = vmatprep.subr.mxu1 %v238_v61 }
  0x47   :  { %467 = vmatpush3.msra.mxu1 %v238_v61 }
  0x48   :  { %468 = vmatprep.subr.mxu1 %v237_v62 }
  0x49   :  { %469 = vmatpush3.msra.mxu1 %v237_v62 }
  0x4a   :  { %470 = vmatprep.subr.mxu1 %v236_v63 }
  0x4b   :  { %471 = vmatpush3.msra.mxu1 %v236_v63 }
  0xaf   :  { %v75_v3 = vpop.xlane.xlu0 %74 }
  0xb0   :  { %v78_v4 = vmul.f32 0.03125, %v75_v3 }
  0xb2   :  { %v640_v5 = vsub.f32 %v72_v0, %v78_v4  ;;  %v88_v29 = vmul.f32 %v78_v4, %v78_v4  ;;  %v367_v0 = vld [vmem:[%s672_s4] ss:$0 sm:$0xff] }
  0xb3   :  { %v77_v6 = vpop.xlane.xlu0 %76 }
  0xb4   :  { %v79_v7 = vmul.f32 0.03125, %v77_v6  ;;  %v82_v8 = vmul.f32 %v640_v5, %v640_v5  ;;  %v90_v31 = vmul.f32 96.0, %v88_v29 }
  0xb6   :  { %v644_v9 = vsub.f32 %v73_v1, %v79_v7  ;;  %84 = vadd.xlane.f32.xlu1 %v82_v8  ;;  %v89_v30 = vmul.f32 %v79_v7, %v79_v7 }
  0xb8   :  { %v83_v10 = vmul.f32 %v644_v9, %v644_v9  ;;  %v91_v34 = vmul.f32 96.0, %v89_v30 }
  0xba   :  { %86 = vadd.xlane.f32.xlu1 %v83_v10 }
 0x13f   :  { %v85_v32 = vpop.xlane.xlu1 %84 }
 0x140   :  { %v92_v33 = vsub.f32 %v85_v32, %v90_v31 }
 0x142   :  { %v94_v35 = vmul.f32 0.03125, %v92_v33 }
 0x143   :  { %v87_v36 = vpop.xlane.xlu1 %86 }
 0x144   :  { %v96_v37 = vadd.f32 1e-05, %v94_v35  ;;  %v93_v38 = vsub.f32 %v87_v36, %v91_v34 }
 0x146   :  { %482 = vrsqrt.f32 %v96_v37  ;;  %v95_v39 = vmul.f32 0.03125, %v93_v38 }
 0x148   :  { %v97_v40 = vadd.f32 1e-05, %v95_v39 }
 0x14a   :  { %484 = vrsqrt.f32 %v97_v40 }
 0x153   :  { %v483_v41 = vpop.eup %482 }
 0x154   :  { %v100_v43 = vmul.f32 %v483_v41, %v640_v5 }
 0x156   :  { %v109_v45 = vmul.f32 %v365_v42, %v100_v43 }
 0x157   :  { %v485_v46 = vpop.eup %484 }
 0x158   :  { %v101_v47 = vmul.f32 %v485_v46, %v644_v9  ;;  %v118_v48 = vadd.f32 %v366_v44, %v109_v45 }
 0x15a   :  { %v110_v49 = vmul.f32 %v365_v42, %v101_v47  ;;  %437 = vmatprep.mubr.f32.mxu0 %v118_v48 }
 0x15c   :  { %v119_v50 = vadd.f32 %v366_v44, %v110_v49 }
 0x15e   :  { %438 = vmatmul.mubr.f32.vlgmr.msra.gmra.mxu0 %v119_v50 }
 0x21e   :  { %v439_v1 = vpop.f32.mrf.mxu0 }
 0x21f   :  { %v221_v2 = vadd.f32 %v439_v1, %v367_v0 }
 0x220   :  { %v215_v3 = vpop.f32.mrf.mxu0 }
 0x221   :  { %v227_v4 = vmul.f32 0.70710677, %v221_v2  ;;  %v216_v5 = vadd.f32 %v367_v0, %v215_v3  ;;  %v225_v12 = vmul.f32 0.5, %v221_v2 }
 0x223   :  { %486 = verf.f32 %v227_v4  ;;  %v226_v6 = vmul.f32 0.70710677, %v216_v5  ;;  %v224_v10 = vmul.f32 0.5, %v216_v5 }
 0x225   :  { %488 = verf.f32 %v226_v6 }
 0x230   :  { %v487_v7 = vpop.eup %486 }
 0x231   :  { %v231_v9 = vadd.f32 1.0, %v487_v7 }
 0x232   :  { %v489_v8 = vpop.eup %488 }
 0x233   :  { %v230_v11 = vadd.f32 1.0, %v489_v8  ;;  %v233_v14 = vmul.f32 %v231_v9, %v225_v12 }
 0x235   :  { %v232_v13 = vmul.f32 %v230_v11, %v224_v10 }
 0x237   :  { %472 = vmatprep.mubr.f32.mxu1 %v232_v13 }
 0x238   :  { %473 = vmatmul.mubr.f32.vlgmr.msra.gmra.mxu1 %v233_v14 }
 0x2f8   :  { %v474_v15 = vpop.f32.mrf.mxu1 }
 0x2f9   :  { %v344_v18 = vadd.f32 %v474_v15, %v368_v16 }
 0x2fa   :  { %v318_v17 = vpop.f32.mrf.mxu1 }
 0x2fb   :  { %v343_v19 = vadd.f32 %v368_v16, %v318_v17  ;;  %346 = vst [vmem:[#allocation9 + $0x8] sm:$0xff] %v344_v18 }
 0x2fd   :  { %345 = vst [vmem:[#allocation9] sm:$0xff] %v343_v19 }
 0x2fe   :  { %561 = shalt.err (!%p558_p5)
}
 0x2ff   :  { %358 = dma.vmem_to_hbm [thread:$0]  %s353_s21, 256, %s675_s7, [#allocation5], %s578_s29, %s578_s29, %s579_s30  }
 0x300   :  { %574 = dma.done.wait [#allocation5], 256  }
 0x301   :  { %575 = vsyncadd [#allocation5], 4294967040 }
 0x302   :  { %362 = vsyncpa [#allocation4], 1 }
 0x303   :  { %363 = vsyncpa [#allocation7], 1 }
 0x304   :  { %364 = vsyncpa [#allocation5], 1 }

</bundles_post_ra>
